<compile_context>
chip_gen: v6e
topology: v6e:2x2x1
jax: 0.10.0
libtpu: 0.0.40
codegen_flags: <defaults>
</compile_context>

<pallas_src>
import functools
import math

import jax
import jax.numpy as jnp
from jax.experimental import pallas as pl
from jax.experimental.pallas import tpu as pltpu


def _decoder_kernel(q_ref, ctx_ref, nmask_ref, w_in_ref, w_outc_ref,
                    w_outq_ref, w_proj_ref, b_proj_ref, out_ref, h_ref,
                    *, approx_recip=True):
    """One (batch-tile, V-tile) grid step.

    q_ref      (M, H)     flattened queries for TB batch rows (M = TB * L)
    ctx_ref    (TB, S, H) encoder context for those batch rows
    nmask_ref  (TB, 1, S) additive mask (0 / -1e30), f32
    w_in_ref   (H, H)     linear_in weight, pre-transposed
    w_outc_ref (H, H)     linear_out weight, wctx half, pre-transposed
    w_outq_ref (H, H)     linear_out weight, query half, pre-transposed
    w_proj_ref (H, TV)    projection weight V-tile, pre-transposed
    b_proj_ref (1, TV)    projection bias V-tile (f32)
    out_ref    (M, TV)    logits tile (bf16 by default)
    h_ref      (M, H)     VMEM scratch: h_tilde, reused across V tiles
    """
    # h_tilde depends only on the batch tile: compute it at the first V tile
    # and stash it (the V axis is 'arbitrary', i.e. sequential per batch tile).
    @pl.when(pl.program_id(1) == 0)
    def _():
        q = q_ref[...]                                   # (M, H) compute dtype
        c = ctx_ref[...]                                 # (TB, S, H)
        tb, s, h = c.shape
        m = q.shape[0]
        l = m // tb

        # linear_in (no bias): big-M MXU matmul, f32 accumulation.
        target = jnp.dot(q, w_in_ref[...],
                         preferred_element_type=jnp.float32)          # (M, H)

        # attention logits: scores[b, l, s] = target[b, l] . ctx[b, s]
        # (same batched contraction pattern as the Pallas flash-attention
        #  reference kernel -> lowers to MXU matmuls per batch row).
        t3 = target.reshape(tb, l, h).astype(c.dtype)
        scores = jnp.einsum('bld,bsd->bls', t3, c,
                            preferred_element_type=jnp.float32)       # (TB, L, S)

        # masked_fill_(mask, -inf) via host-precomputed additive mask, then a
        # numerically-stable softmax in f32.
        # NOTE: a fully-masked row yields a uniform distribution here instead
        # of the NaNs PyTorch's -inf softmax would produce (intentional).
        scores = scores + nmask_ref[...]
        scores = scores - jnp.max(scores, axis=-1, keepdims=True)
        p = jnp.exp(scores)
        denom = jnp.sum(p, axis=-1, keepdims=True)
        if approx_recip:
            p = p * pl.reciprocal(denom, approx=True)    # EUP slot, ~free
        else:
            p = p / denom

        # weighted context: wctx[b, l] = sum_s p[b, l, s] * ctx[b, s]
        wctx = jnp.einsum('bls,bsd->bld', p.astype(c.dtype), c,
                          preferred_element_type=jnp.float32)         # (TB, L, H)
        wctx = wctx.reshape(m, h)

        # linear_out (no bias) on cat([wctx, q]) == two pre-split NN matmuls.
        h_tilde = jnp.tanh(
            jnp.dot(wctx.astype(w_outc_ref.dtype), w_outc_ref[...],
                    preferred_element_type=jnp.float32)
            + jnp.dot(q, w_outq_ref[...],
                      preferred_element_type=jnp.float32))            # (M, H)
        h_ref[...] = h_tilde.astype(h_ref.dtype)

    # Projection for this V tile: the FLOP-dominant matmul with big M and a
    # lane-dense (multiple-of-128) output slab, emitted in bf16 to halve the
    # HBM writeback stream.
    logit = jnp.dot(h_ref[...], w_proj_ref[...],
                    preferred_element_type=jnp.float32) + b_proj_ref[...]
    out_ref[...] = logit.astype(out_ref.dtype)


def _round_up(x, m):
    return -(-x // m) * m


def _detect_vmem_bytes():
    """Physical VMEM per core; conservative 64 MiB if detection fails."""
    try:
        info = pltpu.get_tpu_info()
        v = getattr(info, "vmem_capacity_bytes", None)
        if isinstance(v, int) and v > 0:
            return v
    except Exception:
        pass
    return 64 * 1024 * 1024


def _detect_num_cores():
    """TensorCores per chip (2 on v7x); defaults to 1 if unknown."""
    try:
        info = pltpu.get_tpu_info()
        for attr in ("num_cores", "core_count", "tensorcore_count",
                     "num_tensorcores"):
            v = getattr(info, attr, None)
            if isinstance(v, int) and 0 < v <= 8:
                return v
    except Exception:
        pass
    try:
        v = getattr(jax.devices()[0], "num_cores", None)
        if isinstance(v, int) and 0 < v <= 8:
            return v
    except Exception:
        pass
    return 1


def _plan_tiles(B, L, S, H, V, *, target_rows, target_v_tile, num_cores,
                cd_bytes, out_bytes, budget_bytes):
    """Pick (tb, n_b, B_pad, rows, tv, n_v, V_pad) under a VMEM budget.

    rows = tb*L is kept a multiple of 8 whenever the batch axis is tiled and is
    targeted at ~target_rows (W_proj re-streaming intensity = rows FLOP/byte).
    tv is the full padded V when the resident W_proj (+ everything else,
    conservatively double-buffered) fits the budget, else the largest
    128-multiple that fits.
    """
    rows_step = 8 // math.gcd(L, 8)           # smallest tb with (tb*L) % 8 == 0

    def batch_plan(tb):
        tb = max(rows_step, _round_up(tb, rows_step))
        n_b = -(-B // tb)
        tb = _round_up(-(-B // n_b), rows_step)   # rebalance -> minimal padding
        return tb, n_b, tb * n_b, tb * L

    def vmem(rows_, tb_, tv_):
        return (2 * rows_ * H * cd_bytes              # q tile (double-buffered)
                + 2 * tb_ * S * H * cd_bytes          # ctx tile
                + 2 * tb_ * S * 4                     # additive mask tile (f32)
                + 2 * 3 * H * H * cd_bytes            # W_in^T + W_out^T halves
                + 2 * (H * tv_ * cd_bytes + tv_ * 4)  # W_proj^T tile + bias
                + 2 * rows_ * tv_ * out_bytes         # out tile
                + rows_ * H * cd_bytes)               # h_tilde scratch

    tb0 = max(rows_step, (max(target_rows, L) // L) // rows_step * rows_step)
    if num_cores > 1:
        # keep at least one batch tile per TensorCore (megacore sharding)
        tb0 = min(tb0, _round_up(-(-B // num_cores), rows_step))
    tb0 = min(tb0, _round_up(B, rows_step))
    tb, n_b, B_pad, rows = batch_plan(tb0)

    V_pad128 = _round_up(V, 128)
    if target_v_tile is None:
        first = V_pad128                       # try a fully-resident W_proj
    else:
        first = min(_round_up(target_v_tile, 128), V_pad128)
    candidates = [first] + [t for t in (4096, 2048, 1024, 512, 256, 128)
                            if t < first]

    tv = None
    for cand in candidates:
        if vmem(rows, tb, cand) <= budget_bytes:
            tv = cand
            break
    if tv is None:
        tv = 128
        while tb > rows_step and vmem(tb * L, tb, tv) > budget_bytes:
            tb -= rows_step
        tb, n_b, B_pad, rows = batch_plan(tb)

    V_pad = _round_up(V, tv)
    return tb, n_b, B_pad, rows, tv, V_pad // tv, V_pad


def speaker_decoder_same_lstm(ctx_w, ctx, ctx_mask, w_in, w_out, w_proj, b_proj,
                              *, compute_dtype=jnp.bfloat16,
                              out_dtype=jnp.bfloat16,
                              target_rows=512, target_v_tile=None,
                              vmem_limit_bytes=None, num_cores=None):
    """Eval-mode forward of SpeakerDecoder_SameLSTM.

    ctx_w:    (B, L, H) decoder hidden states
    ctx:      (B, S, H) encoder context
    ctx_mask: (B, S)    nonzero => masked context position
    w_in:     (H, H)    SoftDotAttention.linear_in.weight
    w_out:    (H, 2H)   SoftDotAttention.linear_out.weight (cat order [wctx, q])
    w_proj:   (V, H), b_proj: (V,)   projection
    returns logits (B, L, V) in `out_dtype` (bfloat16 by default; upcast
    outside the kernel if an f32 interface is required downstream).
    """
    B, L, H = ctx_w.shape
    _, S, _ = ctx.shape
    V = w_proj.shape[0]
    cd = jnp.dtype(compute_dtype)
    od = jnp.dtype(out_dtype)

    # --- tile planning against the detected chip -----------------------------
    phys_vmem = _detect_vmem_bytes()
    if vmem_limit_bytes is None:
        vmem_limit_bytes = max(32 * 1024 * 1024,
                               min(int(phys_vmem * 0.75), 100 * 1024 * 1024))
    if num_cores is None:
        num_cores = _detect_num_cores()

    tb, n_b, B_pad, rows, tv, n_v, V_pad = _plan_tiles(
        B, L, S, H, V,
        target_rows=target_rows, target_v_tile=target_v_tile,
        num_cores=num_cores, cd_bytes=cd.itemsize, out_bytes=od.itemsize,
        budget_bytes=int(vmem_limit_bytes * 0.9))

    # --- host-side prep (cheap): flatten/pad inputs, pre-transpose / pre-split
    # weights, precompute the additive mask, cast matmul operands to bf16 -----
    q = ctx_w.reshape(B * L, H).astype(cd)
    ctx_c = ctx.astype(cd)
    neg_mask = jnp.where(ctx_mask.reshape(B, 1, S) > 0, -1e30, 0.0
                         ).astype(jnp.float32)
    if B_pad != B:
        q = jnp.pad(q, ((0, (B_pad - B) * L), (0, 0)))
        ctx_c = jnp.pad(ctx_c, ((0, B_pad - B), (0, 0), (0, 0)))
        neg_mask = jnp.pad(neg_mask, ((0, B_pad - B), (0, 0), (0, 0)))

    w_out = jnp.asarray(w_out)
    w_in_t = jnp.asarray(w_in).T.astype(cd)          # (H, H)
    w_outc_t = w_out[:, :H].T.astype(cd)             # (H, H)  wctx half
    w_outq_t = w_out[:, H:].T.astype(cd)             # (H, H)  query half
    w_proj_t = jnp.asarray(w_proj).T.astype(cd)      # (H, V)
    b_proj2 = jnp.asarray(b_proj).reshape(1, V).astype(jnp.float32)
    if V_pad != V:
        w_proj_t = jnp.pad(w_proj_t, ((0, 0), (0, V_pad - V)))
        b_proj2 = jnp.pad(b_proj2, ((0, 0), (0, V_pad - V)))

    # TODO(synk): nn.Dropout (self.drop) is identity in eval mode; training-mode
    # dropout is not implemented here.
    grid_spec = pltpu.PrefetchScalarGridSpec(
        num_scalar_prefetch=0,
        grid=(n_b, n_v),
        in_specs=[
            pl.BlockSpec((rows, H), lambda i, j: (i, 0)),       # q
            pl.BlockSpec((tb, S, H), lambda i, j: (i, 0, 0)),   # ctx
            pl.BlockSpec((tb, 1, S), lambda i, j: (i, 0, 0)),   # additive mask
            pl.BlockSpec((H, H), lambda i, j: (0, 0)),          # W_in^T
            pl.BlockSpec((H, H), lambda i, j: (0, 0)),          # W_out^T (wctx)
            pl.BlockSpec((H, H), lambda i, j: (0, 0)),          # W_out^T (q)
            pl.BlockSpec((H, tv), lambda i, j: (0, j)),         # W_proj^T V-tile
            pl.BlockSpec((1, tv), lambda i, j: (0, j)),         # bias V-tile
        ],
        out_specs=pl.BlockSpec((rows, tv), lambda i, j: (i, j)),
        scratch_shapes=[pltpu.VMEM((rows, H), cd)],
    )
    # TODO(synk): on VMEM-tight chips (v7x) the grid-constant weight specs
    # (W_in^T / W_out^T halves / bias, and W_proj^T when n_v == 1) could be
    # single-buffered (pipeline_mode=pl.Buffered(1)); they are conservatively
    # budgeted as double-buffered in _plan_tiles instead to stay portable.

    # Advisory cost hint so XLA schedules surrounding ops around the kernel.
    w_proj_reads = 1 if n_v == 1 else n_b   # W_proj re-streamed only if V tiled
    cost = pl.CostEstimate(
        flops=int(2 * B_pad * L * H * (3 * H + 2 * S + V_pad)),
        transcendentals=int(B_pad * L * (S + H + 1)),
        bytes_accessed=int(
            q.size * cd.itemsize + ctx_c.size * cd.itemsize + neg_mask.size * 4
            + 3 * H * H * cd.itemsize
            + w_proj_reads * H * V_pad * cd.itemsize + V_pad * 4
            + B_pad * L * V_pad * od.itemsize),
    )

    kernel = functools.partial(_decoder_kernel,
                               approx_recip=(cd != jnp.dtype(jnp.float32)))

    out = pl.pallas_call(
        kernel,
        out_shape=jax.ShapeDtypeStruct((B_pad * L, V_pad), od),
        grid_spec=grid_spec,
        compiler_params=pltpu.CompilerParams(
            # batch-tile axis shards across TensorCores (v7x megacore);
            # V-tile axis must stay sequential (h_tilde scratch reuse).
            dimension_semantics=("parallel", "arbitrary"),
            vmem_limit_bytes=int(vmem_limit_bytes),
        ),
        cost_estimate=cost,
    )(q, ctx_c, neg_mask, w_in_t, w_outc_t, w_outq_t, w_proj_t, b_proj2)

    if B_pad != B or V_pad != V:
        out = out[:B * L, :V]
    return out.reshape(B, L, V)


def _reference(ctx_w, ctx, ctx_mask, w_in, w_out, w_proj, b_proj):
    """Pure-JAX f32 reference of the same forward pass."""
    B, L, H = ctx_w.shape
    q = ctx_w.reshape(B * L, H)
    c = jnp.repeat(ctx, L, axis=0)                               # (B*L, S, H)
    m = jnp.repeat(ctx_mask, L, axis=0)                          # (B*L, S)
    target = q @ w_in.T
    scores = jnp.einsum('nsh,nh->ns', c, target)
    scores = jnp.where(m > 0.0, -jnp.inf, scores)
    attn = jax.nn.softmax(scores, axis=-1)
    wctx = jnp.einsum('ns,nsh->nh', attn, c)
    h_tilde = jnp.tanh(jnp.concatenate([wctx, q], axis=1) @ w_out.T)
    logit = h_tilde @ w_proj.T + b_proj
    return logit.reshape(B, L, -1)


if __name__ == "__main__":
    B, L, S, H, V = 2, 8, 8, 32, 128

    key = jax.random.PRNGKey(0)
    k = jax.random.split(key, 8)

    ctx_w = jax.random.normal(k[0], (B, L, H), jnp.float32)
    ctx = jax.random.normal(k[1], (B, S, H), jnp.float32)
    # mask the last two context positions of batch row 1
    ctx_mask = jnp.zeros((B, S), jnp.float32).at[1, S - 2:].set(1.0)

    # parameters (matching nn.Linear weight shapes in __init__)
    w_in = jax.random.normal(k[2], (H, H), jnp.float32) * 0.05       # linear_in  (H, H)
    w_out = jax.random.normal(k[3], (H, 2 * H), jnp.float32) * 0.05  # linear_out (H, 2H)
    w_proj = jax.random.normal(k[4], (V, H), jnp.float32) * 0.05     # projection (V, H)
    b_proj = jax.random.normal(k[5], (V,), jnp.float32) * 0.05

    ref = _reference(ctx_w, ctx, ctx_mask, w_in, w_out, w_proj, b_proj)

    # Default (production) config: bf16 compute, bf16 logits.
    out = speaker_decoder_same_lstm(ctx_w, ctx, ctx_mask,
                                    w_in, w_out, w_proj, b_proj)
    out = jax.block_until_ready(out)
    assert out.shape == (B, L, V)
    assert out.dtype == jnp.bfloat16
    assert jnp.allclose(out.astype(jnp.float32), ref, atol=2e-2, rtol=2e-2), \
        "bf16 kernel mismatch vs reference"

    # Tighter check of the kernel itself: f32 compute dtype, f32 output,
    # exact softmax normalization (verifies structure, not just bf16 noise).
    out32 = speaker_decoder_same_lstm(ctx_w, ctx, ctx_mask,
                                      w_in, w_out, w_proj, b_proj,
                                      compute_dtype=jnp.float32,
                                      out_dtype=jnp.float32)
    out32 = jax.block_until_ready(out32)
    assert jnp.allclose(out32, ref, atol=5e-3, rtol=5e-3), \
        "f32 kernel mismatch vs reference"

    print("KERNEL_OK")
</pallas_src>

<mosaic_0001>
module attributes {stable_mosaic.version = 11 : i64} {
  func.func @_decoder_kernel(%arg0: i32, %arg1: i32, %arg2: memref<16x32xbf16, #tpu.memory_space<vmem>>, %arg3: memref<2x8x32xbf16, #tpu.memory_space<vmem>>, %arg4: memref<2x1x8xf32, #tpu.memory_space<vmem>>, %arg5: memref<32x32xbf16, #tpu.memory_space<vmem>>, %arg6: memref<32x32xbf16, #tpu.memory_space<vmem>>, %arg7: memref<32x32xbf16, #tpu.memory_space<vmem>>, %arg8: memref<32x128xbf16, #tpu.memory_space<vmem>>, %arg9: memref<1x128xf32, #tpu.memory_space<vmem>>, %arg10: memref<16x128xbf16, #tpu.memory_space<vmem>>, %arg11: memref<16x32xbf16, #tpu.memory_space<vmem>>) attributes {dimension_semantics = [#tpu.dimension_semantics<parallel>, #tpu.dimension_semantics<arbitrary>], iteration_bounds = array<i64: 1, 1>, scalar_prefetch = 0 : i64, scratch_operands = 1 : i64, tpu.core_type = #tpu.core_type<tc>, window_params = [{transform_indices = @transform_0, window_bounds = array<i64: 16, 32>}, {transform_indices = @transform_1, window_bounds = array<i64: 2, 8, 32>}, {transform_indices = @transform_2, window_bounds = array<i64: 2, 1, 8>}, {pipeline_mode = #tpu.pipeline_mode<synchronous>, transform_indices = @transform_3, window_bounds = array<i64: 32, 32>}, {pipeline_mode = #tpu.pipeline_mode<synchronous>, transform_indices = @transform_4, window_bounds = array<i64: 32, 32>}, {pipeline_mode = #tpu.pipeline_mode<synchronous>, transform_indices = @transform_5, window_bounds = array<i64: 32, 32>}, {transform_indices = @transform_6, window_bounds = array<i64: 32, 128>}, {transform_indices = @transform_7, window_bounds = array<i64: 1, 128>}, {transform_indices = @transform_8, window_bounds = array<i64: 16, 128>}]} {
    %c0_i32 = arith.constant 0 : i32
    %0 = arith.cmpi eq, %arg1, %c0_i32 : i32
    %1 = arith.extui %0 : i1 to i32
    %c0_i32_0 = arith.constant 0 : i32
    %2 = arith.cmpi ne, %1, %c0_i32_0 : i32
    scf.if %2 {
      %c0_8 = arith.constant 0 : index
      %c0_9 = arith.constant 0 : index
      %11 = vector.load %arg2[%c0_8, %c0_9] : memref<16x32xbf16, #tpu.memory_space<vmem>>, vector<16x32xbf16>
      %c0_10 = arith.constant 0 : index
      %c0_11 = arith.constant 0 : index
      %c0_12 = arith.constant 0 : index
      %12 = vector.load %arg3[%c0_10, %c0_11, %c0_12] : memref<2x8x32xbf16, #tpu.memory_space<vmem>>, vector<2x8x32xbf16>
      %c0_13 = arith.constant 0 : index
      %c0_14 = arith.constant 0 : index
      %13 = vector.load %arg5[%c0_13, %c0_14] : memref<32x32xbf16, #tpu.memory_space<vmem>>, vector<32x32xbf16>
      %cst_15 = arith.constant dense<0.000000e+00> : vector<16x32xf32>
      %14 = tpu.matmul %11, %13, %cst_15 {dimension_numbers = #tpu.dot_dimension_numbers<[1], [0], [0], [1], [0, 0, 1, 1], [], []>} : vector<16x32xbf16>, vector<32x32xbf16>, vector<16x32xf32> -> vector<16x32xf32>
      %15 = vector.shape_cast %14 : vector<16x32xf32> to vector<2x8x32xf32>
      %16 = arith.truncf %15 : vector<2x8x32xf32> to vector<2x8x32xbf16>
      "tpu.trace_start"() <{level = 10 : i32, message = "bld,bsd->bls"}> : () -> ()
      %cst_16 = arith.constant dense<0.000000e+00> : vector<2x8x8xf32>
      %17 = tpu.matmul %16, %12, %cst_16 {dimension_numbers = #tpu.dot_dimension_numbers<[2], [2], [1], [1], [0, 0, 0, 1, 1, 1], [0], [0]>} : vector<2x8x32xbf16>, vector<2x8x32xbf16>, vector<2x8x8xf32> -> vector<2x8x8xf32>
      "tpu.trace_stop"() : () -> ()
      %c0_17 = arith.constant 0 : index
      %c0_18 = arith.constant 0 : index
      %c0_19 = arith.constant 0 : index
      %18 = vector.load %arg4[%c0_17, %c0_18, %c0_19] : memref<2x1x8xf32, #tpu.memory_space<vmem>>, vector<2x1x8xf32>
      %19 = vector.broadcast %18 : vector<2x1x8xf32> to vector<2x8x8xf32>
      %20 = arith.addf %17, %19 : vector<2x8x8xf32>
      %cst_20 = arith.constant dense<0xFF800000> : vector<2x8xf32>
      %21 = vector.multi_reduction <maximumf>, %20, %cst_20 [2] : vector<2x8x8xf32> to vector<2x8xf32>
      %22 = vector.shape_cast %21 : vector<2x8xf32> to vector<2x8x1xf32>
      %23 = vector.broadcast %22 : vector<2x8x1xf32> to vector<2x8x8xf32>
      %24 = arith.subf %20, %23 : vector<2x8x8xf32>
      %25 = math.exp %24 : vector<2x8x8xf32>
      %cst_21 = arith.constant dense<0.000000e+00> : vector<2x8xf32>
      %26 = vector.multi_reduction <add>, %25, %cst_21 [2] : vector<2x8x8xf32> to vector<2x8xf32>
      %27 = vector.shape_cast %26 : vector<2x8xf32> to vector<2x8x1xf32>
      %28 = tpu.reciprocal %27 {approx = true} : vector<2x8x1xf32> -> vector<2x8x1xf32>
      %29 = vector.broadcast %28 : vector<2x8x1xf32> to vector<2x8x8xf32>
      %30 = arith.mulf %25, %29 : vector<2x8x8xf32>
      %31 = arith.truncf %30 : vector<2x8x8xf32> to vector<2x8x8xbf16>
      "tpu.trace_start"() <{level = 10 : i32, message = "bls,bsd->bld"}> : () -> ()
      %cst_22 = arith.constant dense<0.000000e+00> : vector<2x8x32xf32>
      %32 = tpu.matmul %31, %12, %cst_22 {dimension_numbers = #tpu.dot_dimension_numbers<[2], [1], [1], [2], [0, 0, 0, 1, 1, 2], [0], [0]>} : vector<2x8x8xbf16>, vector<2x8x32xbf16>, vector<2x8x32xf32> -> vector<2x8x32xf32>
      "tpu.trace_stop"() : () -> ()
      %33 = vector.shape_cast %32 : vector<2x8x32xf32> to vector<16x32xf32>
      %34 = arith.truncf %33 : vector<16x32xf32> to vector<16x32xbf16>
      %c0_23 = arith.constant 0 : index
      %c0_24 = arith.constant 0 : index
      %35 = vector.load %arg6[%c0_23, %c0_24] : memref<32x32xbf16, #tpu.memory_space<vmem>>, vector<32x32xbf16>
      %cst_25 = arith.constant dense<0.000000e+00> : vector<16x32xf32>
      %36 = tpu.matmul %34, %35, %cst_25 {dimension_numbers = #tpu.dot_dimension_numbers<[1], [0], [0], [1], [0, 0, 1, 1], [], []>} : vector<16x32xbf16>, vector<32x32xbf16>, vector<16x32xf32> -> vector<16x32xf32>
      %c0_26 = arith.constant 0 : index
      %c0_27 = arith.constant 0 : index
      %37 = vector.load %arg7[%c0_26, %c0_27] : memref<32x32xbf16, #tpu.memory_space<vmem>>, vector<32x32xbf16>
      %cst_28 = arith.constant dense<0.000000e+00> : vector<16x32xf32>
      %38 = tpu.matmul %11, %37, %cst_28 {dimension_numbers = #tpu.dot_dimension_numbers<[1], [0], [0], [1], [0, 0, 1, 1], [], []>} : vector<16x32xbf16>, vector<32x32xbf16>, vector<16x32xf32> -> vector<16x32xf32>
      %39 = arith.addf %36, %38 : vector<16x32xf32>
      %40 = math.tanh %39 : vector<16x32xf32>
      %41 = arith.truncf %40 : vector<16x32xf32> to vector<16x32xbf16>
      %c0_29 = arith.constant 0 : index
      %c0_30 = arith.constant 0 : index
      %42 = vector.load %arg11[%c0_29, %c0_30] : memref<16x32xbf16, #tpu.memory_space<vmem>>, vector<16x32xbf16>
      tpu.vector_store %arg11[%c0_29, %c0_30], %41 {strides = array<i32>} : memref<16x32xbf16, #tpu.memory_space<vmem>>, vector<16x32xbf16>,
    } else {
    }
    %c0 = arith.constant 0 : index
    %c0_1 = arith.constant 0 : index
    %3 = vector.load %arg11[%c0, %c0_1] : memref<16x32xbf16, #tpu.memory_space<vmem>>, vector<16x32xbf16>
    %c0_2 = arith.constant 0 : index
    %c0_3 = arith.constant 0 : index
    %4 = vector.load %arg8[%c0_2, %c0_3] : memref<32x128xbf16, #tpu.memory_space<vmem>>, vector<32x128xbf16>
    %cst = arith.constant dense<0.000000e+00> : vector<16x128xf32>
    %5 = tpu.matmul %3, %4, %cst {dimension_numbers = #tpu.dot_dimension_numbers<[1], [0], [0], [1], [0, 0, 1, 1], [], []>} : vector<16x32xbf16>, vector<32x128xbf16>, vector<16x128xf32> -> vector<16x128xf32>
    %c0_4 = arith.constant 0 : index
    %c0_5 = arith.constant 0 : index
    %6 = vector.load %arg9[%c0_4, %c0_5] : memref<1x128xf32, #tpu.memory_space<vmem>>, vector<1x128xf32>
    %7 = vector.broadcast %6 : vector<1x128xf32> to vector<16x128xf32>
    %8 = arith.addf %5, %7 : vector<16x128xf32>
    %9 = arith.truncf %8 : vector<16x128xf32> to vector<16x128xbf16>
    %c0_6 = arith.constant 0 : index
    %c0_7 = arith.constant 0 : index
    %10 = vector.load %arg10[%c0_6, %c0_7] : memref<16x128xbf16, #tpu.memory_space<vmem>>, vector<16x128xbf16>
    tpu.vector_store %arg10[%c0_6, %c0_7], %9 {strides = array<i32>} : memref<16x128xbf16, #tpu.memory_space<vmem>>, vector<16x128xbf16>,
    return
  }
  func.func @transform_0(%arg0: i32, %arg1: i32) -> (i32, i32) {
    %c0_i32 = arith.constant 0 : i32
    %c0_i32_0 = arith.constant 0 : i32
    return %arg0, %c0_i32 : i32, i32
  }
  func.func @transform_1(%arg0: i32, %arg1: i32) -> (i32, i32, i32) {
    %c0_i32 = arith.constant 0 : i32
    %c0_i32_0 = arith.constant 0 : i32
    %c0_i32_1 = arith.constant 0 : i32
    return %arg0, %c0_i32, %c0_i32_0 : i32, i32, i32
  }
  func.func @transform_2(%arg0: i32, %arg1: i32) -> (i32, i32, i32) {
    %c0_i32 = arith.constant 0 : i32
    %c0_i32_0 = arith.constant 0 : i32
    %c0_i32_1 = arith.constant 0 : i32
    return %arg0, %c0_i32, %c0_i32_0 : i32, i32, i32
  }
  func.func @transform_3(%arg0: i32, %arg1: i32) -> (i32, i32) {
    %c0_i32 = arith.constant 0 : i32
    %c0_i32_0 = arith.constant 0 : i32
    %c0_i32_1 = arith.constant 0 : i32
    return %c0_i32, %c0_i32_0 : i32, i32
  }
  func.func @transform_4(%arg0: i32, %arg1: i32) -> (i32, i32) {
    %c0_i32 = arith.constant 0 : i32
    %c0_i32_0 = arith.constant 0 : i32
    %c0_i32_1 = arith.constant 0 : i32
    return %c0_i32, %c0_i32_0 : i32, i32
  }
  func.func @transform_5(%arg0: i32, %arg1: i32) -> (i32, i32) {
    %c0_i32 = arith.constant 0 : i32
    %c0_i32_0 = arith.constant 0 : i32
    %c0_i32_1 = arith.constant 0 : i32
    return %c0_i32, %c0_i32_0 : i32, i32
  }
  func.func @transform_6(%arg0: i32, %arg1: i32) -> (i32, i32) {
    %c0_i32 = arith.constant 0 : i32
    %c0_i32_0 = arith.constant 0 : i32
    return %c0_i32, %arg1 : i32, i32
  }
  func.func @transform_7(%arg0: i32, %arg1: i32) -> (i32, i32) {
    %c0_i32 = arith.constant 0 : i32
    %c0_i32_0 = arith.constant 0 : i32
    return %c0_i32, %arg1 : i32, i32
  }
  func.func @transform_8(%arg0: i32, %arg1: i32) -> (i32, i32) {
    %c0_i32 = arith.constant 0 : i32
    return %arg0, %arg1 : i32, i32
  }
}

</mosaic_0001>

<bundles_post_ra>
// kernel: tpu_custom_call.1
= control target key start
LH: loop header
LB: loop body
LE: loop exit
PB: predicated region body
PF: predicated region fallthrough
CT: control target
= control target key end

     0   :  { %13 = vsyncpa [#allocation4], 0  ;;  %s1095_s0 = inlined_call_operand.hbm [shape: bf16[16,32], index: 0, kind: input, shape index: {}]   ;;  %s1096_s1 = inlined_call_operand.hbm [shape: bf16[2,8,32], index: 1, kind: input, shape index: {}]   ;;  %s1097_s2 = inlined_call_operand.vmem [shape: f32[2,1,8], index: 2, kind: input, shape index: {}]   ;;  %s1098_s3 = inlined_call_operand.hbm [shape: bf16[32,32], index: 3, kind: input, shape index: {}]   ;;  %s1099_s4 = inlined_call_operand.hbm [shape: bf16[32,32], index: 4, kind: input, shape index: {}]   ;;  %s1100_s5 = inlined_call_operand.hbm [shape: bf16[32,32], index: 5, kind: input, shape index: {}]   ;;  %s1101_s6 = inlined_call_operand.hbm [shape: bf16[32,128], index: 6, kind: input, shape index: {}]   ;;  %s1102_s7 = inlined_call_operand.vmem [shape: f32[1,128], index: 7, kind: input, shape index: {}]   ;;  %s1103_s8 = inlined_call_operand.hbm [shape: bf16[16,128], index: 8, kind: output, shape index: {}]  }
   0x1   :  { %14 = vsyncpa [#allocation7], 0 }
   0x2   :  { %15 = vsyncpa [#allocation10], 0 }
   0x3   :  { %16 = vsyncpa [#allocation13], 0 }
   0x4   :  { %17 = vsyncpa [#allocation5], 0  ;;  %s940_s27 = smov [#allocation6]   ;;  %s941_s29 = smov [#allocation9]  }
   0x5   :  { %s35_s28 = sshll.u32 %s940_s27, 4  ;;  %s61_s30 = sshll.u32 %s941_s29, 4  ;;  %s36_s28 = int_to_ptr.vmem [resolvable:$true] %s35_s28  ;;  %s62_s30 = int_to_ptr.vmem [resolvable:$true] %s61_s30 }
   0x6   :  { %s798_s9 = scalar_lea.vmem %s36_s28, 128  ;;  %p803_p1 = scmp.lt.s32.totalorder %s36_s28, %s36_s28 }
   0x7   :  { %p799_p0 = scmp.ne.s32.totalorder %s36_s28, %s798_s9  ;;  %p804_p2 = scmp.lt.s32.totalorder %s798_s9, %s798_s9 }
   0x9   :  { %p805_p3 = por %p804_p2, %p803_p1 }
   0xb   :  { %p806_p4 = pnand %p805_p3, %p799_p0 }
   0xd   :  { %809 = shalt.err (!%p806_p4)
}
   0xe   :  { %s942_s10 = smov 64   ;;  %s943_s11 = smov 4  }
   0xf   :  { %41 = dma.hbm_to_vmem [thread:$0]  %s1096_s1, 128, %s36_s28, [#allocation7], %s942_s10, %s942_s10, %s943_s11  }
  0x10   :  { %s818_s14 = scalar_lea.vmem %s62_s30, 256  ;;  %p823_p6 = scmp.lt.s32.totalorder %s62_s30, %s62_s30 }
  0x11   :  { %p819_p5 = scmp.ne.s32.totalorder %s62_s30, %s818_s14  ;;  %p824_p7 = scmp.lt.s32.totalorder %s818_s14, %s818_s14 }
  0x13   :  { %p825_p8 = por %p824_p7, %p823_p6 }
  0x15   :  { %p826_p9 = pnand %p825_p8, %p819_p5 }
  0x17   :  { %829 = shalt.err (!%p826_p9)
}
  0x18   :  { %67 = dma.hbm_to_vmem [thread:$0]  %s1099_s4, 256, %s62_s30, [#allocation10], %s942_s10, %s942_s10, %s943_s11  }
  0x19   :  { %s944_s17 = smov [#allocation3]   ;;  %s945_s19 = smov [#allocation8]  }
  0x1a   :  { %s23_s18 = sshll.u32 %s944_s17, 4  ;;  %s49_s20 = sshll.u32 %s945_s19, 4  ;;  %s24_s18 = int_to_ptr.vmem [resolvable:$true] %s23_s18  ;;  %s50_s20 = int_to_ptr.vmem [resolvable:$true] %s49_s20 }
  0x1b   :  { %s838_s1 = scalar_lea.vmem %s24_s18, 128  ;;  %p843_p11 = scmp.lt.s32.totalorder %s24_s18, %s24_s18 }
  0x1c   :  { %p839_p10 = scmp.ne.s32.totalorder %s24_s18, %s838_s1  ;;  %p844_p12 = scmp.lt.s32.totalorder %s838_s1, %s838_s1 }
  0x1e   :  { %p845_p13 = por %p844_p12, %p843_p11 }
  0x20   :  { %p846_p0 = pnand %p845_p13, %p839_p10 }
  0x22   :  { %849 = shalt.err (!%p846_p0)
}
  0x23   :  { %29 = dma.hbm_to_vmem [thread:$0]  %s1095_s0, 128, %s24_s18, [#allocation4], %s942_s10, %s942_s10, %s943_s11  }
  0x24   :  { %s858_s4 = scalar_lea.vmem %s50_s20, 256  ;;  %p863_p2 = scmp.lt.s32.totalorder %s50_s20, %s50_s20 }
  0x25   :  { %p859_p1 = scmp.ne.s32.totalorder %s50_s20, %s858_s4  ;;  %p864_p3 = scmp.lt.s32.totalorder %s858_s4, %s858_s4 }
  0x27   :  { %p865_p4 = por %p864_p3, %p863_p2 }
  0x29   :  { %p866_p5 = pnand %p865_p4, %p859_p1 }
  0x2b   :  { %869 = shalt.err (!%p866_p5)
}
  0x2c   :  { %55 = dma.hbm_to_vmem [thread:$0]  %s1098_s3, 256, %s50_s20, [#allocation7], %s942_s10, %s942_s10, %s943_s11  }
  0x2d   :  { %s946_s25 = smov [#allocation11]   ;;  %s947_s27 = smov [#allocation12]  }
  0x2e   :  { %s73_s26 = sshll.u32 %s946_s25, 4  ;;  %s85_s28 = sshll.u32 %s947_s27, 4  ;;  %s74_s26 = int_to_ptr.vmem [resolvable:$true] %s73_s26  ;;  %s86_s28 = int_to_ptr.vmem [resolvable:$true] %s85_s28 }
  0x2f   :  { %s878_s0 = scalar_lea.vmem %s74_s26, 256  ;;  %p883_p7 = scmp.lt.s32.totalorder %s74_s26, %s74_s26 }
  0x30   :  { %p879_p6 = scmp.ne.s32.totalorder %s74_s26, %s878_s0  ;;  %p884_p8 = scmp.lt.s32.totalorder %s878_s0, %s878_s0 }
  0x32   :  { %p885_p9 = por %p884_p8, %p883_p7 }
  0x34   :  { %p886_p10 = pnand %p885_p9, %p879_p6 }
  0x36   :  { %889 = shalt.err (!%p886_p10)
}
  0x37   :  { %79 = dma.hbm_to_vmem [thread:$0]  %s1100_s5, 256, %s74_s26, [#allocation10], %s942_s10, %s942_s10, %s943_s11  }
  0x38   :  { %s898_s3 = scalar_lea.vmem %s86_s28, 256  ;;  %p903_p12 = scmp.lt.s32.totalorder %s86_s28, %s86_s28 }
  0x39   :  { %p899_p11 = scmp.ne.s32.totalorder %s86_s28, %s898_s3  ;;  %p904_p13 = scmp.lt.s32.totalorder %s898_s3, %s898_s3 }
  0x3b   :  { %p905_p0 = por %p904_p13, %p903_p12 }
  0x3d   :  { %p906_p1 = pnand %p905_p0, %p899_p11 }
  0x3f   :  { %909 = shalt.err (!%p906_p1)
}
  0x40   :  { %91 = dma.hbm_to_vmem [thread:$0]  %s1101_s6, 256, %s86_s28, [#allocation13], %s942_s10, %s942_s10, %s943_s11  }
  0x41   :  { %930 = dma.done.wait [#allocation4], 128  }
  0x42   :  { %931 = vsyncadd [#allocation4], 4294967168 }
  0x43   :  { %932 = dma.done.wait [#allocation7], 384  }
  0x44   :  { %933 = vsyncadd [#allocation7], 4294966912 }
  0x45   :  { %934 = dma.done.wait [#allocation10], 512  }
  0x46   :  { %935 = vsyncadd [#allocation10], 4294966784 }
  0x47   :  { %936 = dma.done.wait [#allocation13], 256  }
  0x48   :  { %937 = vsyncadd [#allocation13], 4294967040  ;;  %v948_v0 = vmov 0.0   ;;  %vm949_vm0 = vmmov 0   ;;  %v768_v1 = vld [vmem:[#allocation8 + $0x8] sm:$0xff]   ;;  %v769_v2 = vld [vmem:[#allocation8] sm:$0xff]  }
  0x49   :  { %701 = vmatprep.subr.bf16.mxu0 %v948_v0  ;;  %705 = vmatprep.mubr.msk.bf16.mxu0 %vm949_vm0, %v948_v0  ;;  %vm142_vm1 = vcmask 261120   ;;  %v119_v3 = vld [vmem:[#allocation6] sm:$0xf]  ;;  %v120_v4 = vld [vmem:[#allocation6 + $0x4] sm:$0xf]  ;;  %v1039_v5 = vld [vmem:[#allocation3] sm:$0xff]  }
  0x4a   :  { %709 = vmatprep.subr.bf16.mxu1 %v948_v0  ;;  %711 = vmatprep.mubr.msk.bf16.mxu1 %vm949_vm0, %v948_v0  ;;  %v207_v6 = vsel %vm142_vm1, %v119_v3, 0  ;;  %v253_v7 = vsel %vm142_vm1, %v120_v4, 0  ;;  %vm323_vm2 = vcmask 1043456   ;;  %v651_v15 = vld [vmem:[%s1097_s2] ss:$0 sm:$0xff]  ;;  %vm295_vm3 = vcmask 64512  }
  0x4b   :  { %702 = vmatpush3.bf16.msra.mxu0 %v768_v1  ;;  %710 = vmatpush3.bf16.xpose.msra.mxu1 %v207_v6  ;;  %v324_v9 = vsel %vm323_vm2, %v119_v3, 0  ;;  %v652_v19 = vld [vmem:[%s1097_s2 + $0x1] ss:$0 sm:$0xff]  ;;  %v369_v39 = vsel %vm323_vm2, %v120_v4, 0  ;;  %v772_v48 = vld [vmem:[#allocation11] sm:$0xff]   ;;  %v773_v49 = vld [vmem:[#allocation9 + $0x8] sm:$0xff]  }
  0x4c   :  { %703 = vmatprep.subr.bf16.mxu0 %v948_v0  ;;  %721 = vmatprep.subr.bf16.mxu1 %v948_v0  ;;  %v771_v44 = vld [vmem:[#allocation11 + $0x8] sm:$0xff]   ;;  %v774_v51 = vld [vmem:[#allocation9] sm:$0xff]   ;;  %vm539_vm4 = vcmask 257024   ;;  %s950_s16 = smov [#allocation14]  }
  0x4d   :  { %v776_v3 = vld [vmem:[#allocation12] sm:$0xff]   ;;  %s632_s17 = sshll.u32 %s950_s16, 4  ;;  %s633_s17 = int_to_ptr.vmem [resolvable:$true] %s632_s17 }
  0x4e   :  { %s910_s18 = scalar_lea.vmem %s633_s17, 128  ;;  %p915_p3 = scmp.lt.s32.totalorder %s633_s17, %s633_s17 }
  0x4f   :  { %704 = vmatpush3.bf16.msra.mxu0 %v769_v2  ;;  %v775_v2 = vld [vmem:[#allocation12 + $0x8] sm:$0xff]   ;;  %p911_p2 = scmp.ne.s32.totalorder %s633_s17, %s910_s18  ;;  %p916_p4 = scmp.lt.s32.totalorder %s910_s18, %s910_s18 }
  0x50   :  { %715 = vmatprep.subr.bf16.mxu0 %v948_v0 }
  0x51   :  { %p917_p5 = por %p916_p4, %p915_p3 }
  0x52   :  { %706 = vmatmul.mubr.msk.bf16.vlgmr.msra.gmra.mxu0 %vm142_vm1, %v1039_v5 }
  0x53   :  { %716 = vmatpush3.bf16.xpose.msra.mxu0 %v253_v7  ;;  %717 = vmatprep.mubr.msk.bf16.mxu0 %vm949_vm0, %v948_v0  ;;  %p918_p6 = pnand %p917_p5, %p911_p2 }
  0x54   :  { %727 = vmatprep.subr.bf16.mxu0 %v948_v0 }
 0x112   :  { %v180_v8 = vpop.f32.mrf.mxu0 }
 0x113   :  { %v187_v10 = vpack.c.bf16 %v180_v8, %v180_v8 }
 0x114   :  { %v707_v11 = vpop.f32.mrf.mxu0 }
 0x115   :  { %712 = vmatmul.mubr.msk.bf16.vlgmr.msra.gmra.mxu1 %vm142_vm1, %v187_v10 }
 0x116   :  { %v183_v12 = vpop.f32.mrf.mxu0  ;;  %722 = vmatpush3.bf16.msra.mxu1 %v324_v9  ;;  %723 = vmatprep.mubr.msk.bf16.mxu1 %vm949_vm0, %v948_v0 }
 0x117   :  { %v188_v13 = vpack.c.bf16 %v183_v12, %v183_v12  ;;  %733 = vmatprep.subr.bf16.mxu1 %v948_v0 }
 0x118   :  { %v708_v14 = vpop.f32.mrf.mxu0 }
 0x119   :  { %718 = vmatmul.mubr.msk.bf16.vlgmr.msra.gmra.mxu0 %vm142_vm1, %v188_v13 }
 0x11a   :  { %729 = vmatprep.mubr.msk.bf16.mxu0 %vm949_vm0, %v948_v0  ;;  %728 = vmatpush3.bf16.msra.mxu0 %v369_v39 }
 0x11b   :  { %741 = vmatprep.subr.bf16.mxu0 %v948_v0 }
 0x1d5   :  { %v243_v16 = vpop.f32.mrf.mxu1 }
 0x1d6   :  { %v244_v17 = vadd.f32 %v651_v15, %v243_v16  ;;  %v665_v15 = vld [vmem:[%s1102_s7] ss:$0 sm:$0xff] }
 0x1d7   :  { %v713_v18 = vpop.f32.mrf.mxu1 }
 0x1d8   :  { %v296_v20 = vsel %vm295_vm3, %v244_v17, -inf }
 0x1d9   :  { %297 = vmax.xlane.f32.xlu0 %v296_v20  ;;  %v246_v21 = vpop.f32.mrf.mxu1  ;;  %v289_v22 = vpop.f32.mrf.mxu0 }
 0x1da   :  { %v290_v23 = vadd.f32 %v652_v19, %v289_v22 }
 0x1db   :  { %v714_v24 = vpop.f32.mrf.mxu1  ;;  %v719_v25 = vpop.f32.mrf.mxu0 }
 0x1dc   :  { %v299_v26 = vsel %vm295_vm3, %v290_v23, -inf }
 0x1dd   :  { %300 = vmax.xlane.f32.xlu0 %v299_v26  ;;  %v292_v27 = vpop.f32.mrf.mxu0 }
 0x1df   :  { %v720_v28 = vpop.f32.mrf.mxu0 }
 0x262   :  { %v298_v29 = vpop.xlane.xlu0 %297 }
 0x263   :  { %v302_v30 = vsub.f32 %v244_v17, %v298_v29 }
 0x265   :  { %v304_v31 = vmul.f32 1.442695, %v302_v30 }
 0x266   :  { %v301_v32 = vpop.xlane.xlu0 %300 }
 0x267   :  { %778 = vpow2.f32 %v304_v31  ;;  %v303_v33 = vsub.f32 %v290_v23, %v301_v32 }
 0x269   :  { %v306_v34 = vmul.f32 1.442695, %v303_v33 }
 0x26b   :  { %780 = vpow2.f32 %v306_v34 }
 0x274   :  { %v779_v35 = vpop.eup %778 }
 0x275   :  { %v308_v36 = vsel %vm295_vm3, %v779_v35, 0.0 }
 0x276   :  { %309 = vadd.xlane.f32.xlu1 %v308_v36 }
 0x278   :  { %v781_v37 = vpop.eup %780 }
 0x279   :  { %v311_v38 = vsel %vm295_vm3, %v781_v37, 0.0 }
 0x27a   :  { %312 = vadd.xlane.f32.xlu1 %v311_v38 }
 0x2ff   :  { %v310_v40 = vpop.xlane.xlu1 %309 }
 0x300   :  { %782 = vrcp.f32 %v310_v40 }
 0x303   :  { %v313_v41 = vpop.xlane.xlu1 %312 }
 0x304   :  { %784 = vrcp.f32 %v313_v41 }
 0x30d   :  { %v783_v42 = vpop.eup %782 }
 0x30e   :  { %v316_v43 = vmul.f32 %v783_v42, %v779_v35 }
 0x310   :  { %v318_v45 = vpack.c.bf16 %v316_v43, %v316_v43 }
 0x311   :  { %v785_v46 = vpop.eup %784 }
 0x312   :  { %724 = vmatmul.mubr.msk.bf16.vlgmr.msra.gmra.mxu1 %vm295_vm3, %v318_v45  ;;  %v317_v47 = vmul.f32 %v785_v46, %v781_v37 }
 0x313   :  { %734 = vmatpush3.bf16.msra.mxu1 %v771_v44  ;;  %737 = vmatprep.mubr.msk.bf16.mxu1 %vm949_vm0, %v948_v0 }
 0x314   :  { %v319_v50 = vpack.c.bf16 %v317_v47, %v317_v47  ;;  %735 = vmatprep.subr.bf16.mxu1 %v948_v0 }
 0x316   :  { %730 = vmatmul.mubr.msk.bf16.vlgmr.msra.gmra.mxu0 %vm295_vm3, %v319_v50 }
 0x317   :  { %736 = vmatpush3.bf16.msra.mxu1 %v772_v48  ;;  %742 = vmatpush3.bf16.msra.mxu0 %v773_v49 }
 0x318   :  { %743 = vmatprep.subr.bf16.mxu0 %v948_v0  ;;  %745 = vmatprep.mubr.msk.bf16.mxu0 %vm949_vm0, %v948_v0 }
 0x319   :  { %749 = vmatprep.subr.bf16.mxu1 %v948_v0 }
 0x31a   :  { %738 = vmatmul.mubr.msk.bf16.vlgmr.msra.gmra.mxu1 %vm142_vm1, %v1039_v5 }
 0x31b   :  { %753 = vmatprep.mubr.msk.bf16.mxu1 %vm949_vm0, %v948_v0  ;;  %744 = vmatpush3.bf16.msra.mxu0 %v774_v51 }
 0x31c   :  { %750 = vmatpush3.bf16.msra.mxu1 %v775_v2 }
 0x31d   :  { %751 = vmatprep.subr.bf16.mxu1 %v948_v0 }
 0x320   :  { %752 = vmatpush3.bf16.msra.mxu1 %v776_v3 }
 0x3d2   :  { %v360_v52 = vpop.f32.mrf.mxu1 }
 0x3d4   :  { %v725_v53 = vpop.f32.mrf.mxu1 }
 0x3d6   :  { %v363_v54 = vpop.f32.mrf.mxu1  ;;  %v405_v55 = vpop.f32.mrf.mxu0 }
 0x3d7   :  { %v411_v56 = vpack.c.bf16 %v405_v55, %v360_v52 }
 0x3d8   :  { %v726_v57 = vpop.f32.mrf.mxu1  ;;  %v731_v58 = vpop.f32.mrf.mxu0 }
 0x3d9   :  { %746 = vmatmul.mubr.msk.bf16.vlgmr.msra.gmra.mxu0 %vm142_vm1, %v411_v56 }
 0x3da   :  { %v408_v59 = vpop.f32.mrf.mxu0  ;;  %v466_v60 = vpop.f32.mrf.mxu1 }
 0x3dc   :  { %v732_v61 = vpop.f32.mrf.mxu0  ;;  %v739_v62 = vpop.f32.mrf.mxu1 }
 0x3de   :  { %v469_v63 = vpop.f32.mrf.mxu1 }
 0x3e0   :  { %v740_v1 = vpop.f32.mrf.mxu1 }
 0x499   :  { %v522_v4 = vpop.f32.mrf.mxu0 }
 0x49a   :  { %v523_v5 = vadd.f32 %v522_v4, %v466_v60 }
 0x49b   :  { %v747_v6 = vpop.f32.mrf.mxu0 }
 0x49c   :  { %786 = vtanh.f32 %v523_v5 }
 0x49d   :  { %v525_v7 = vpop.f32.mrf.mxu0 }
 0x49e   :  { %v526_v8 = vadd.f32 %v525_v7, %v469_v63 }
 0x49f   :  { %v748_v9 = vpop.f32.mrf.mxu0 }
 0x4a0   :  { %788 = vtanh.f32 %v526_v8 }
 0x4a9   :  { %v787_v10 = vpop.eup %786 }
 0x4aa   :  { %v672_v11 = vpack.c.bf16 %v787_v10, %v787_v10 }
 0x4ac   :  { %540 = vst.msk [vmem:[#allocation2] sm:$0xf] %vm539_vm4, %v672_v11 }
 0x4ad   :  { %v789_v12 = vpop.eup %788 }
 0x4ae   :  { %v673_v13 = vpack.c.bf16 %v789_v12, %v789_v12 }
 0x4b0   :  { %541 = vst.msk [vmem:[#allocation2 + $0x4] sm:$0xf] %vm539_vm4, %v673_v13 }
 0x4b7   :  { %v777_v14 = vld [vmem:[#allocation2] sm:$0xff]  }
 0x4b8   :  { %754 = vmatmul.mubr.msk.bf16.vlgmr.msra.gmra.mxu1 %vm142_vm1, %v777_v14 }
 0x578   :  { %v610_v0 = vpop.f32.mrf.mxu1 }
 0x579   :  { %v611_v18 = vadd.f32 %v665_v15, %v610_v0 }
 0x57a   :  { %v755_v16 = vpop.f32.mrf.mxu1 }
 0x57c   :  { %v613_v17 = vpop.f32.mrf.mxu1 }
 0x57d   :  { %v614_v19 = vadd.f32 %v665_v15, %v613_v17 }
 0x57e   :  { %v756_v20 = vpop.f32.mrf.mxu1 }
 0x57f   :  { %v679_v21 = vpack.c.bf16 %v614_v19, %v611_v18 }
 0x581   :  { %680 = vst [vmem:[#allocation14] sm:$0xff] %v679_v21  }
 0x582   :  { %921 = shalt.err (!%p918_p6)
}
 0x583   :  { %638 = dma.vmem_to_hbm [thread:$0]  %s633_s17, 128, %s1103_s8, [#allocation5], %s942_s10, %s942_s10, %s943_s11  }
 0x584   :  { %938 = dma.done.wait [#allocation5], 128  }
 0x585   :  { %939 = vsyncadd [#allocation5], 4294967168 }
 0x586   :  { %642 = vsyncpa [#allocation4], 1 }
 0x587   :  { %643 = vsyncpa [#allocation7], 1 }
 0x588   :  { %644 = vsyncpa [#allocation10], 1 }
 0x589   :  { %645 = vsyncpa [#allocation13], 1 }
 0x58a   :  { %646 = vsyncpa [#allocation5], 1 }

</bundles_post_ra>
